<compile_context>
chip_gen: v5e
topology: v5e:2x2
jax: 0.10.0
libtpu: 0.0.40
codegen_flags: <defaults>
</compile_context>

<pallas_src>
import functools

import jax
import jax.numpy as jnp
from jax import lax
from jax.experimental import pallas as pl
from jax.experimental.pallas import tpu as pltpu


def _round_up(x: int, m: int) -> int:
    return ((x + m - 1) // m) * m


def _cross_attn_kernel(x1_ref, x2_ref, wq_ref, bq_ref, wk_ref, bk_ref,
                       wv_ref, bv_ref, o_ref, k_scr, v_scr,
                       *, scale, s2_true, s2_pad):
    i = pl.program_id(1)

    # K/V projection: once per batch element (first query tile only); kept in
    # bf16 VMEM scratch across the "arbitrary" query-tile grid axis.
    @pl.when(i == 0)
    def _():
        x2 = x2_ref[...]                                            # (S2p, Lp) bf16
        k = jnp.dot(x2, wk_ref[...], preferred_element_type=jnp.float32) + bk_ref[...]
        v = jnp.dot(x2, wv_ref[...], preferred_element_type=jnp.float32) + bv_ref[...]
        k_scr[...] = k.astype(k_scr.dtype)
        v_scr[...] = v.astype(v_scr.dtype)

    # Q projection for this query tile (bf16 operands, f32 accumulation).
    q = (jnp.dot(x1_ref[...], wq_ref[...], preferred_element_type=jnp.float32)
         + bq_ref[...]).astype(jnp.bfloat16)                        # (tq, Dp)

    # Scaled dot-product attention; contract the feature axis of Q and K
    # directly on the MXU (no explicit K transpose through the XLU).
    s = lax.dot_general(q, k_scr[...],
                        dimension_numbers=(((1,), (1,)), ((), ())),
                        preferred_element_type=jnp.float32) * (1.0 / scale)

    if s2_pad != s2_true:
        # Mask padded key columns; exact since exp(-1e30 - m) underflows to 0.
        col = lax.broadcasted_iota(jnp.int32, s.shape, 1)
        s = jnp.where(col < s2_true, s, -1e30)

    m = jnp.max(s, axis=-1, keepdims=True)
    p = jnp.exp(s - m)
    denom = jnp.sum(p, axis=-1, keepdims=True)
    w = (p * pl.reciprocal(denom, approx=True)).astype(jnp.bfloat16)  # EUP slot

    o_ref[...] = jnp.dot(w, v_scr[...],
                         preferred_element_type=jnp.float32).astype(o_ref.dtype)


def cross_attention(input1, input2, params, *, tq=None):
    """input1: (B, S1, dim), input2: (B, S2, lenth) -> (B, S1, dim) f32."""
    B, S1, D = input1.shape
    B2, S2, L = input2.shape
    assert B2 == B
    scale = float(D) ** 0.5          # PyTorch: sqrt(dim), independent of padding.

    # Lane-dense feature / key dims (multiples of 128).
    Dp = _round_up(D, 128)
    Lp = _round_up(L, 128)
    S2p = _round_up(S2, 128)

    # Generation-aware VMEM budget (v7x: 64 MiB/TC, v5e/v6e: 128 MiB).
    try:
        vmem_cap = int(pltpu.get_tpu_info().vmem_capacity_bytes)
    except Exception:
        vmem_cap = 64 * 1024 * 1024
    budget = (vmem_cap * 3) // 4

    if tq is None:
        tq = min(_round_up(S1, 128), 512 if vmem_cap >= 96 * 1024 * 1024 else 256)
    tq = max(8, _round_up(tq, 8))

    def footprint(tq_):
        bf16, f32 = 2, 4
        return (2 * tq_ * Dp * bf16                      # input1 tiles (double-buffered)
                + 2 * S2p * Lp * bf16                    # input2 block
                + 2 * tq_ * Dp * f32                     # output tiles
                + 2 * (Dp * Dp + 2 * Lp * Dp) * bf16     # weights (double-buffered)
                + 2 * 3 * Dp * f32                       # biases
                + 2 * S2p * Dp * bf16                    # K/V scratch
                + tq_ * Dp * (f32 + bf16)                # q
                + 3 * tq_ * S2p * f32                    # scores / exp / weights
                + 2 * S2p * Dp * f32)                    # K/V projection temporaries

    while tq > 128 and 2 * footprint(tq) > budget:
        tq = max(128, _round_up(tq // 2, 8))
    vmem_limit = int(min(max(2 * footprint(tq), 32 * 1024 * 1024), budget))

    S1p = _round_up(S1, tq)

    f32, bf16 = jnp.float32, jnp.bfloat16
    # Zero padding is exact: padded Q/K feature columns are zero (QK^T unchanged),
    # padded V columns are zero (sliced off), padded key rows are masked in-kernel.
    x1 = jnp.pad(input1.astype(f32), ((0, 0), (0, S1p - S1), (0, Dp - D))).astype(bf16)
    x2 = jnp.pad(input2.astype(f32), ((0, 0), (0, S2p - S2), (0, Lp - L))).astype(bf16)

    # nn.Linear stores W as (out, in); pre-transpose to (in, out), pad, cast to bf16.
    wq_t = jnp.pad(params["wq"].astype(f32).T, ((0, Dp - D), (0, Dp - D))).astype(bf16)
    wk_t = jnp.pad(params["wk"].astype(f32).T, ((0, Lp - L), (0, Dp - D))).astype(bf16)
    wv_t = jnp.pad(params["wv"].astype(f32).T, ((0, Lp - L), (0, Dp - D))).astype(bf16)
    bq = jnp.pad(params["bq"].astype(f32), (0, Dp - D)).reshape(1, Dp)
    bk = jnp.pad(params["bk"].astype(f32), (0, Dp - D)).reshape(1, Dp)
    bv = jnp.pad(params["bv"].astype(f32), (0, Dp - D)).reshape(1, Dp)

    kernel = functools.partial(_cross_attn_kernel, scale=scale,
                               s2_true=S2, s2_pad=S2p)

    out_padded = pl.pallas_call(
        kernel,
        out_shape=jax.ShapeDtypeStruct((B, S1p, Dp), jnp.float32),
        grid_spec=pltpu.PrefetchScalarGridSpec(
            num_scalar_prefetch=0,
            grid=(B, S1p // tq),
            in_specs=[
                pl.BlockSpec((None, tq, Dp), lambda b, i: (b, i, 0)),    # input1 tile
                pl.BlockSpec((None, S2p, Lp), lambda b, i: (b, 0, 0)),   # input2 (per batch)
                pl.BlockSpec((Dp, Dp), lambda b, i: (0, 0)),             # Wq^T
                pl.BlockSpec((1, Dp), lambda b, i: (0, 0)),              # bq
                pl.BlockSpec((Lp, Dp), lambda b, i: (0, 0)),             # Wk^T
                pl.BlockSpec((1, Dp), lambda b, i: (0, 0)),              # bk
                pl.BlockSpec((Lp, Dp), lambda b, i: (0, 0)),             # Wv^T
                pl.BlockSpec((1, Dp), lambda b, i: (0, 0)),              # bv
            ],
            out_specs=pl.BlockSpec((None, tq, Dp), lambda b, i: (b, i, 0)),
            scratch_shapes=[pltpu.VMEM((S2p, Dp), jnp.bfloat16),         # K scratch
                            pltpu.VMEM((S2p, Dp), jnp.bfloat16)],        # V scratch
        ),
        compiler_params=pltpu.CompilerParams(
            dimension_semantics=("parallel", "arbitrary"),
            vmem_limit_bytes=vmem_limit,
        ),
    )(x1, x2, wq_t, bq, wk_t, bk, wv_t, bv)

    return out_padded[:, :S1, :D]


def cross_attention_ref(input1, input2, params):
    """Pure-JAX f32 reference, mirrors the PyTorch forward exactly."""
    D = input1.shape[-1]
    q = input1 @ params["wq"].T + params["bq"]
    k = input2 @ params["wk"].T + params["bk"]
    v = input2 @ params["wv"].T + params["bv"]
    s = jnp.einsum("bqd,bkd->bqk", q, k) / (float(D) ** 0.5)
    w = jax.nn.softmax(s, axis=-1)
    return jnp.einsum("bqk,bkd->bqd", w, v)


def _make_params(key, dim, lenth):
    k3, k4, k5, k6, k7, k8 = jax.random.split(key, 6)
    return {
        "wq": jax.random.normal(k3, (dim, dim), dtype=jnp.float32) * 0.1,
        "bq": jax.random.normal(k4, (dim,), dtype=jnp.float32) * 0.1,
        "wk": jax.random.normal(k5, (dim, lenth), dtype=jnp.float32) * 0.1,
        "bk": jax.random.normal(k6, (dim,), dtype=jnp.float32) * 0.1,
        "wv": jax.random.normal(k7, (dim, lenth), dtype=jnp.float32) * 0.1,
        "bv": jax.random.normal(k8, (dim,), dtype=jnp.float32) * 0.1,
    }


def _bf16_round(t):
    return t.astype(jnp.bfloat16).astype(jnp.float32)


def _check(out, input1, input2, params, tag):
    # Tight check against a reference computed from bf16-rounded operands
    # (kernel feeds the MXU bf16 operands), plus a looser structural check
    # against the exact f32 reference.
    ref_bf = cross_attention_ref(_bf16_round(input1), _bf16_round(input2),
                                 {k: _bf16_round(v) for k, v in params.items()})
    ref_f32 = cross_attention_ref(input1, input2, params)
    assert jnp.allclose(out, ref_bf, atol=1.5e-2, rtol=1.5e-2), f"{tag}: bf16-ref mismatch"
    assert jnp.allclose(out, ref_f32, atol=5e-2, rtol=5e-2), f"{tag}: f32-ref mismatch"


if __name__ == "__main__":
    key = jax.random.PRNGKey(0)
    k_in1, k_in2, k_par, k_in3, k_in4, k_par2 = jax.random.split(key, 6)

    # Case 1: small shapes matching the module's intended use.
    B, S1, S2, dim, lenth = 2, 8, 8, 32, 16
    input1 = jax.random.normal(k_in1, (B, S1, dim), dtype=jnp.float32)
    input2 = jax.random.normal(k_in2, (B, S2, lenth), dtype=jnp.float32)
    params = _make_params(k_par, dim, lenth)

    out = jax.block_until_ready(cross_attention(input1, input2, params))
    assert out.shape == (B, S1, dim)
    _check(out, input1, input2, params, "case-1")

    # Case 2: exercises multi-tile query axis (KV scratch carried across the
    # "arbitrary" grid axis) + ragged/padded feature and key dims.
    B, S1, S2, dim, lenth = 2, 72, 24, 160, 48
    input1 = jax.random.normal(k_in3, (B, S1, dim), dtype=jnp.float32)
    input2 = jax.random.normal(k_in4, (B, S2, lenth), dtype=jnp.float32)
    params = _make_params(k_par2, dim, lenth)

    out = jax.block_until_ready(cross_attention(input1, input2, params, tq=32))
    assert out.shape == (B, S1, dim)
    _check(out, input1, input2, params, "case-2")

    print("KERNEL_OK")
</pallas_src>

<mosaic_0001>
module attributes {stable_mosaic.version = 11 : i64} {
  func.func @_cross_attn_kernel(%arg0: i32, %arg1: i32, %arg2: memref<1x128x128xbf16, #tpu.memory_space<vmem>>, %arg3: memref<1x128x128xbf16, #tpu.memory_space<vmem>>, %arg4: memref<128x128xbf16, #tpu.memory_space<vmem>>, %arg5: memref<1x128xf32, #tpu.memory_space<vmem>>, %arg6: memref<128x128xbf16, #tpu.memory_space<vmem>>, %arg7: memref<1x128xf32, #tpu.memory_space<vmem>>, %arg8: memref<128x128xbf16, #tpu.memory_space<vmem>>, %arg9: memref<1x128xf32, #tpu.memory_space<vmem>>, %arg10: memref<1x128x128xf32, #tpu.memory_space<vmem>>, %arg11: memref<128x128xbf16, #tpu.memory_space<vmem>>, %arg12: memref<128x128xbf16, #tpu.memory_space<vmem>>) attributes {dimension_semantics = [#tpu.dimension_semantics<parallel>, #tpu.dimension_semantics<arbitrary>], iteration_bounds = array<i64: 2, 1>, scalar_prefetch = 0 : i64, scratch_operands = 2 : i64, tpu.core_type = #tpu.core_type<tc>, window_params = [{transform_indices = @transform_0, window_bounds = array<i64: 1, 128, 128>}, {transform_indices = @transform_1, window_bounds = array<i64: 1, 128, 128>}, {pipeline_mode = #tpu.pipeline_mode<synchronous>, transform_indices = @transform_2, window_bounds = array<i64: 128, 128>}, {pipeline_mode = #tpu.pipeline_mode<synchronous>, transform_indices = @transform_3, window_bounds = array<i64: 1, 128>}, {pipeline_mode = #tpu.pipeline_mode<synchronous>, transform_indices = @transform_4, window_bounds = array<i64: 128, 128>}, {pipeline_mode = #tpu.pipeline_mode<synchronous>, transform_indices = @transform_5, window_bounds = array<i64: 1, 128>}, {pipeline_mode = #tpu.pipeline_mode<synchronous>, transform_indices = @transform_6, window_bounds = array<i64: 128, 128>}, {pipeline_mode = #tpu.pipeline_mode<synchronous>, transform_indices = @transform_7, window_bounds = array<i64: 1, 128>}, {transform_indices = @transform_8, window_bounds = array<i64: 1, 128, 128>}]} {
    %c0_i32 = arith.constant 0 : i32
    %0 = arith.cmpi eq, %arg1, %c0_i32 : i32
    %1 = arith.extui %0 : i1 to i32
    %c0_i32_0 = arith.constant 0 : i32
    %2 = arith.cmpi ne, %1, %c0_i32_0 : i32
    scf.if %2 {
      %c0_20 = arith.constant 0 : index
      %c0_21 = arith.constant 0 : index
      %c0_22 = arith.constant 0 : index
      %36 = vector.load %arg3[%c0_20, %c0_21, %c0_22] : memref<1x128x128xbf16, #tpu.memory_space<vmem>>, vector<1x128x128xbf16>
      %37 = vector.shape_cast %36 : vector<1x128x128xbf16> to vector<128x128xbf16>
      %c0_23 = arith.constant 0 : index
      %c0_24 = arith.constant 0 : index
      %38 = vector.load %arg6[%c0_23, %c0_24] : memref<128x128xbf16, #tpu.memory_space<vmem>>, vector<128x128xbf16>
      %cst_25 = arith.constant dense<0.000000e+00> : vector<128x128xf32>
      %39 = tpu.matmul %37, %38, %cst_25 {dimension_numbers = #tpu.dot_dimension_numbers<[1], [0], [0], [1], [0, 0, 1, 1], [], []>} : vector<128x128xbf16>, vector<128x128xbf16>, vector<128x128xf32> -> vector<128x128xf32>
      %c0_26 = arith.constant 0 : index
      %c0_27 = arith.constant 0 : index
      %40 = vector.load %arg7[%c0_26, %c0_27] : memref<1x128xf32, #tpu.memory_space<vmem>>, vector<1x128xf32>
      %41 = vector.broadcast %40 : vector<1x128xf32> to vector<128x128xf32>
      %42 = arith.addf %39, %41 : vector<128x128xf32>
      %c0_28 = arith.constant 0 : index
      %c0_29 = arith.constant 0 : index
      %43 = vector.load %arg8[%c0_28, %c0_29] : memref<128x128xbf16, #tpu.memory_space<vmem>>, vector<128x128xbf16>
      %cst_30 = arith.constant dense<0.000000e+00> : vector<128x128xf32>
      %44 = tpu.matmul %37, %43, %cst_30 {dimension_numbers = #tpu.dot_dimension_numbers<[1], [0], [0], [1], [0, 0, 1, 1], [], []>} : vector<128x128xbf16>, vector<128x128xbf16>, vector<128x128xf32> -> vector<128x128xf32>
      %c0_31 = arith.constant 0 : index
      %c0_32 = arith.constant 0 : index
      %45 = vector.load %arg9[%c0_31, %c0_32] : memref<1x128xf32, #tpu.memory_space<vmem>>, vector<1x128xf32>
      %46 = vector.broadcast %45 : vector<1x128xf32> to vector<128x128xf32>
      %47 = arith.addf %44, %46 : vector<128x128xf32>
      %48 = arith.truncf %42 : vector<128x128xf32> to vector<128x128xbf16>
      %c0_33 = arith.constant 0 : index
      %c0_34 = arith.constant 0 : index
      %49 = vector.load %arg11[%c0_33, %c0_34] : memref<128x128xbf16, #tpu.memory_space<vmem>>, vector<128x128xbf16>
      tpu.vector_store %arg11[%c0_33, %c0_34], %48 {strides = array<i32>} : memref<128x128xbf16, #tpu.memory_space<vmem>>, vector<128x128xbf16>,
      %50 = arith.truncf %47 : vector<128x128xf32> to vector<128x128xbf16>
      %c0_35 = arith.constant 0 : index
      %c0_36 = arith.constant 0 : index
      %51 = vector.load %arg12[%c0_35, %c0_36] : memref<128x128xbf16, #tpu.memory_space<vmem>>, vector<128x128xbf16>
      tpu.vector_store %arg12[%c0_35, %c0_36], %50 {strides = array<i32>} : memref<128x128xbf16, #tpu.memory_space<vmem>>, vector<128x128xbf16>,
    } else {
    }
    %c0 = arith.constant 0 : index
    %c0_1 = arith.constant 0 : index
    %c0_2 = arith.constant 0 : index
    %3 = vector.load %arg2[%c0, %c0_1, %c0_2] : memref<1x128x128xbf16, #tpu.memory_space<vmem>>, vector<1x128x128xbf16>
    %4 = vector.shape_cast %3 : vector<1x128x128xbf16> to vector<128x128xbf16>
    %c0_3 = arith.constant 0 : index
    %c0_4 = arith.constant 0 : index
    %5 = vector.load %arg4[%c0_3, %c0_4] : memref<128x128xbf16, #tpu.memory_space<vmem>>, vector<128x128xbf16>
    %cst = arith.constant dense<0.000000e+00> : vector<128x128xf32>
    %6 = tpu.matmul %4, %5, %cst {dimension_numbers = #tpu.dot_dimension_numbers<[1], [0], [0], [1], [0, 0, 1, 1], [], []>} : vector<128x128xbf16>, vector<128x128xbf16>, vector<128x128xf32> -> vector<128x128xf32>
    %c0_5 = arith.constant 0 : index
    %c0_6 = arith.constant 0 : index
    %7 = vector.load %arg5[%c0_5, %c0_6] : memref<1x128xf32, #tpu.memory_space<vmem>>, vector<1x128xf32>
    %8 = vector.broadcast %7 : vector<1x128xf32> to vector<128x128xf32>
    %9 = arith.addf %6, %8 : vector<128x128xf32>
    %10 = arith.truncf %9 : vector<128x128xf32> to vector<128x128xbf16>
    %c0_7 = arith.constant 0 : index
    %c0_8 = arith.constant 0 : index
    %11 = vector.load %arg11[%c0_7, %c0_8] : memref<128x128xbf16, #tpu.memory_space<vmem>>, vector<128x128xbf16>
    %cst_9 = arith.constant dense<0.000000e+00> : vector<128x128xf32>
    %12 = tpu.matmul %10, %11, %cst_9 {dimension_numbers = #tpu.dot_dimension_numbers<[1], [1], [0], [0], [0, 0, 1, 0], [], []>} : vector<128x128xbf16>, vector<128x128xbf16>, vector<128x128xf32> -> vector<128x128xf32>
    %cst_10 = arith.constant 0.176776692 : f32
    %13 = vector.broadcast %cst_10 : f32 to vector<128x128xf32>
    %14 = arith.mulf %12, %13 : vector<128x128xf32>
    %15 = tpu.iota {dimensions = array<i32: 1>} : vector<128x128xi32>
    %c8_i32 = arith.constant 8 : i32
    %16 = vector.broadcast %c8_i32 : i32 to vector<128x128xi32>
    %17 = arith.cmpi slt, %15, %16 : vector<128x128xi32>
    %cst_11 = arith.constant -1.000000e+30 : f32
    %18 = vector.broadcast %cst_11 : f32 to vector<128x128xf32>
    %19 = arith.select %17, %14, %18 : vector<128x128xi1>, vector<128x128xf32>
    %cst_12 = arith.constant dense<0xFF800000> : vector<128xf32>
    %20 = vector.multi_reduction <maximumf>, %19, %cst_12 [1] : vector<128x128xf32> to vector<128xf32>
    %21 = vector.shape_cast %20 : vector<128xf32> to vector<128x1xf32>
    %22 = vector.broadcast %21 : vector<128x1xf32> to vector<128x128xf32>
    %23 = arith.subf %19, %22 : vector<128x128xf32>
    %24 = math.exp %23 : vector<128x128xf32>
    %cst_13 = arith.constant dense<0.000000e+00> : vector<128xf32>
    %25 = vector.multi_reduction <add>, %24, %cst_13 [1] : vector<128x128xf32> to vector<128xf32>
    %26 = vector.shape_cast %25 : vector<128xf32> to vector<128x1xf32>
    %27 = tpu.reciprocal %26 {approx = true} : vector<128x1xf32> -> vector<128x1xf32>
    %28 = vector.broadcast %27 : vector<128x1xf32> to vector<128x128xf32>
    %29 = arith.mulf %24, %28 : vector<128x128xf32>
    %30 = arith.truncf %29 : vector<128x128xf32> to vector<128x128xbf16>
    %c0_14 = arith.constant 0 : index
    %c0_15 = arith.constant 0 : index
    %31 = vector.load %arg12[%c0_14, %c0_15] : memref<128x128xbf16, #tpu.memory_space<vmem>>, vector<128x128xbf16>
    %cst_16 = arith.constant dense<0.000000e+00> : vector<128x128xf32>
    %32 = tpu.matmul %30, %31, %cst_16 {dimension_numbers = #tpu.dot_dimension_numbers<[1], [0], [0], [1], [0, 0, 1, 1], [], []>} : vector<128x128xbf16>, vector<128x128xbf16>, vector<128x128xf32> -> vector<128x128xf32>
    %c0_17 = arith.constant 0 : index
    %c0_18 = arith.constant 0 : index
    %c0_19 = arith.constant 0 : index
    %33 = vector.load %arg10[%c0_17, %c0_18, %c0_19] : memref<1x128x128xf32, #tpu.memory_space<vmem>>, vector<1x128x128xf32>
    %34 = vector.shape_cast %33 : vector<1x128x128xf32> to vector<128x128xf32>
    %35 = vector.shape_cast %32 : vector<128x128xf32> to vector<1x128x128xf32>
    tpu.vector_store %arg10[%c0_17, %c0_18, %c0_19], %35 {strides = array<i32>} : memref<1x128x128xf32, #tpu.memory_space<vmem>>, vector<1x128x128xf32>,
    return
  }
  func.func @transform_0(%arg0: i32, %arg1: i32) -> (i32, i32, i32) {
    %c0_i32 = arith.constant 0 : i32
    %c0_i32_0 = arith.constant 0 : i32
    return %arg0, %arg1, %c0_i32 : i32, i32, i32
  }
  func.func @transform_1(%arg0: i32, %arg1: i32) -> (i32, i32, i32) {
    %c0_i32 = arith.constant 0 : i32
    %c0_i32_0 = arith.constant 0 : i32
    %c0_i32_1 = arith.constant 0 : i32
    return %arg0, %c0_i32, %c0_i32_0 : i32, i32, i32
  }
  func.func @transform_2(%arg0: i32, %arg1: i32) -> (i32, i32) {
    %c0_i32 = arith.constant 0 : i32
    %c0_i32_0 = arith.constant 0 : i32
    %c0_i32_1 = arith.constant 0 : i32
    return %c0_i32, %c0_i32_0 : i32, i32
  }
  func.func @transform_3(%arg0: i32, %arg1: i32) -> (i32, i32) {
    %c0_i32 = arith.constant 0 : i32
    %c0_i32_0 = arith.constant 0 : i32
    %c0_i32_1 = arith.constant 0 : i32
    return %c0_i32, %c0_i32_0 : i32, i32
  }
  func.func @transform_4(%arg0: i32, %arg1: i32) -> (i32, i32) {
    %c0_i32 = arith.constant 0 : i32
    %c0_i32_0 = arith.constant 0 : i32
    %c0_i32_1 = arith.constant 0 : i32
    return %c0_i32, %c0_i32_0 : i32, i32
  }
  func.func @transform_5(%arg0: i32, %arg1: i32) -> (i32, i32) {
    %c0_i32 = arith.constant 0 : i32
    %c0_i32_0 = arith.constant 0 : i32
    %c0_i32_1 = arith.constant 0 : i32
    return %c0_i32, %c0_i32_0 : i32, i32
  }
  func.func @transform_6(%arg0: i32, %arg1: i32) -> (i32, i32) {
    %c0_i32 = arith.constant 0 : i32
    %c0_i32_0 = arith.constant 0 : i32
    %c0_i32_1 = arith.constant 0 : i32
    return %c0_i32, %c0_i32_0 : i32, i32
  }
  func.func @transform_7(%arg0: i32, %arg1: i32) -> (i32, i32) {
    %c0_i32 = arith.constant 0 : i32
    %c0_i32_0 = arith.constant 0 : i32
    %c0_i32_1 = arith.constant 0 : i32
    return %c0_i32, %c0_i32_0 : i32, i32
  }
  func.func @transform_8(%arg0: i32, %arg1: i32) -> (i32, i32, i32) {
    %c0_i32 = arith.constant 0 : i32
    %c0_i32_0 = arith.constant 0 : i32
    return %arg0, %arg1, %c0_i32 : i32, i32, i32
  }
}

</mosaic_0001>

<bundles_post_ra>
// kernel: tpu_custom_call.1
= control target key start
LH: loop header
LB: loop body
LE: loop exit
PB: predicated region body
PF: predicated region fallthrough
CT: control target
= control target key end

     0   :  { %s2901_s0 = inlined_call_operand.hbm [shape: bf16[2,128,128], index: 0, kind: input, shape index: {}]   ;;  %s2902_s1 = inlined_call_operand.hbm [shape: bf16[2,128,128], index: 1, kind: input, shape index: {}]   ;;  %s2903_s2 = inlined_call_operand.hbm [shape: bf16[128,128], index: 2, kind: input, shape index: {}]   ;;  %s2904_s3 = inlined_call_operand.vmem [shape: f32[1,128], index: 3, kind: input, shape index: {}]   ;;  %s2905_s4 = inlined_call_operand.hbm [shape: bf16[128,128], index: 4, kind: input, shape index: {}]   ;;  %s2906_s5 = inlined_call_operand.vmem [shape: f32[1,128], index: 5, kind: input, shape index: {}]   ;;  %s2907_s6 = inlined_call_operand.hbm [shape: bf16[128,128], index: 6, kind: input, shape index: {}]   ;;  %s2908_s7 = inlined_call_operand.vmem [shape: f32[1,128], index: 7, kind: input, shape index: {}]   ;;  %s2909_s8 = inlined_call_operand.hbm [shape: f32[2,128,128], index: 8, kind: output, shape index: {}]  }
   0x1   :  { %2918 = sst [smem:[#allocation24_spill]] %s2903_s2 }
   0x2   :  { %2919 = sst [smem:[#allocation25_spill]] %s2905_s4 }
   0x3   :  { %2920 = sst [smem:[#allocation26_spill]] %s2907_s6 }
   0x4   :  { %13 = vsyncpa [#allocation5], 0 }
   0x5   :  { %15 = vsyncpa [#allocation5 + $0x1], 0 }
   0x6   :  { %16 = vsyncpa [#allocation8], 0 }
   0x7   :  { %18 = vsyncpa [#allocation8 + $0x1], 0 }
   0x8   :  { %19 = vsyncpa [#allocation11], 0 }
   0x9   :  { %20 = vsyncpa [#allocation6], 0 }
   0xa   :  { %22 = vsyncpa [#allocation6 + $0x1], 0  ;;  %s2462_s27 = smov 0   ;;  %s2464_s28 = smov 0  }
   0xb   :  { %s2466_s29 = smov 0   ;;  %s2468_s30 = smov 0  }
   0xc   :  { %s2470_s9 = smov 0   ;;  %s2472_s10 = smov 0  }
   0xd LB: > { %2921 = sst [smem:[#allocation19_spill]] %s2388_s27  ;;  %s2493_s11 = sadd.s32 4294967295, %s2408_s10   ;;  %s2408_s10 = sphi %s2472_s10, %s28_s10   ;;  %s2404_s9 = sphi %s2470_s9, %s2941_s9   ;;  %s2400_s30 = sphi %s2468_s30, %s2940_s30   ;;  %s2396_s29 = sphi %s2466_s29, %s2944_s29   ;;  %s2392_s28 = sphi %s2464_s28, %s2943_s28   ;;  %s2388_s27 = sphi %s2462_s27, %s2942_s27  }
   0xe   : > { %2922 = sst [smem:[#allocation20_spill]] %s2404_s9  ;;  %s1578_s12 = sadd.s32 4294967294, %s2408_s10  }
   0xf   : > { %p62_p0 = scmp.ne.s32.totalorder %s2392_s28, %s2388_s27  ;;  %p63_p1 = scmp.eq.s32.totalorder %s2493_s11, 0 }
  0x10   : > { %p240_p2 = scmp.eq.s32.totalorder %s2493_s11, 1  ;;  %p246_p3 = scmp.eq.s32.totalorder %s1578_s12, 1 }
  0x11   : > { %p2502_p4 = por %p63_p1, %p62_p0  ;;  %p1579_p5 = scmp.ge.s32.totalorder %s2408_s10, 1 }
  0x12   : > { %p2507_p6 = por %p246_p3, %p62_p0  ;;  %p253_p7 = scmp.lt.s32.totalorder %s2408_s10, 3 }
  0x13   : > { %s2926_s2 = sld [smem:[#allocation24_spill]]  ;;  %s2410_s19 = smov [#allocation9]  }
  0x14   : > { %s2924_s14 = scalar_select %p2507_p6, 1, 0 }
  0x15   : > { %p2515_p8 = pnand %p1579_p5, %p253_p7  ;;  %s266_s20 = sshll.u32 %s2410_s19, 4  ;;  %s267_s20 = int_to_ptr.vmem [resolvable:$true] %s266_s20 }
  0x16   : > { %2925 = sst [smem:[#allocation21_spill]] %s2924_s14  ;;  %p1583_p11 = scmp.ge.s32.totalorder %s2408_s10, 2 }
  0x17   : > { %p2013_p9 = pneg %p2515_p8  ;;  %s2929_s4 = sld [smem:[#allocation25_spill]] }
  0x18   : > { %s2910_s25 = smov 64   ;;  %s2912_s26 = smov 4  }
  0x19   : > { %s264_s17 = sshll.u32 %s2926_s2, 4  ;;  %p2523_p10 = pnand %p2013_p9, %p63_p1  ;;  %s265_s17 = int_to_ptr.hbm [resolvable:$true] %s264_s17 }
  0x1a   : > { %s2413_s12 = smov [#allocation10]   ;;  %s2930_s6 = sld [smem:[#allocation26_spill]] }
  0x1b   : > { %2016 = dma.hbm_to_vmem [thread:$0]  (!%p2523_p10), %s265_s17, 1024, %s267_s20, [#allocation8], %s2910_s25, %s2910_s25, %s2912_s26  }
  0x1c   : > { %s283_s15 = sshll.u32 %s2413_s12, 4  ;;  %s2414_s23 = smov [#allocation12]   ;;  %s284_s15 = int_to_ptr.vmem [resolvable:$true] %s283_s15 }
  0x1d   : > { %s281_s24 = sshll.u32 %s2929_s4, 4  ;;  %s300_s2 = sshll.u32 %s2414_s23, 4  ;;  %s282_s24 = int_to_ptr.hbm [resolvable:$true] %s281_s24  ;;  %s301_s2 = int_to_ptr.vmem [resolvable:$true] %s300_s2 }
  0x1e   : > { %2019 = dma.hbm_to_vmem [thread:$0]  (!%p2523_p10), %s282_s24, 1024, %s284_s15, [#allocation11], %s2910_s25, %s2910_s25, %s2912_s26  }
  0x1f   : > { %s40_s17 = sadd.s32 1, %s2404_s9  ;;  %s49_s20 = sadd.s32 1, %s2396_s29 }
  0x20   : > { %s298_s22 = sshll.u32 %s2930_s6, 4  ;;  %p42_p12 = scmp.ge.s32.totalorder %s40_s17, 2  ;;  %s299_s22 = int_to_ptr.hbm [resolvable:$true] %s298_s22 }
  0x21   : > { %2022 = dma.hbm_to_vmem [thread:$0]  (!%p2523_p10), %s299_s22, 1024, %s301_s2, [#allocation11], %s2910_s25, %s2910_s25, %s2912_s26  }
  0x22   : > { %p56_p13 = scmp.ne.s32.totalorder %s2396_s29, %s2392_s28  ;;  %p57_p0 = scmp.eq.s32.totalorder %s2408_s10, 0 }
  0x23   : > { %s2946_s17 = smov (%p42_p12, %s40_s17), 0  ;;  %p2037_p7 = scmp.lt.s32.totalorder %s2408_s10, 2 }
  0x24   : > { %2931 = sst [smem:[#allocation22_spill]] %s2946_s17  ;;  %p2556_p3 = por %p57_p0, %p56_p13 }
  0x25   : > { %p2562_p5 = por %p240_p2, %p56_p13  ;;  %s44_s12 = ssub.s32 %s2404_s9, %s2946_s17 }
  0x26   : > { %p47_p9 = scmp.eq.s32.totalorder %s44_s12, 0  ;;  %s317_s2 = sand.u32 1, %s2396_s29  }
  0x27   : > { %s1584_s15 = sshll.u32 %s317_s2, 6  ;;  %s1826_s19 = sshll.u32 %s2404_s9, 6 }
  0x28   : > { %s2571_s16 = scalar_select %p47_p9, %s2396_s29, %s49_s20  }
  0x29   : > { %s328_s25 = scalar_lea.hbm %s2901_s0, %s1826_s19  ;;  %s321_s26 = scalar_lea.vmem [#allocation4], %s1584_s15 }
  0x2a   : > { %2934 = sst [smem:[#allocation23_spill]] %s2571_s16  ;;  %s331_s4 = sshll.u32 %s321_s26, 4  ;;  %s332_s4 = int_to_ptr.vmem [resolvable:$true] %s331_s4 }
  0x2b   : > { %s329_s6 = sshll.u32 %s328_s25, 4  ;;  %p2024_p2 = pnand %p2037_p7, %p2556_p3  ;;  %s330_s6 = int_to_ptr.hbm [resolvable:$true] %s329_s6 }
  0x2c   : > { %s350_s12 = scalar_lea.hbm %s2902_s1, %s1826_s19  ;;  %s318_s20 = scalar_lea.sflag [#allocation5], %s317_s2 }
  0x2d   : > { %s351_s27 = sshll.u32 %s350_s12, 4  ;;  %s2935_s16 = smov 4   ;;  %s352_s27 = int_to_ptr.hbm [resolvable:$true] %s351_s27 }
  0x2e   : > { %s2936_s9 = smov 64   ;;  %s345_s22 = scalar_lea.vmem [#allocation7], %s1584_s15 }
  0x2f   : > { %2026 = dma.hbm_to_vmem [thread:$0]  (!%p2024_p2), %s330_s6, 1024, %s332_s4, %s318_s20, %s2936_s9, %s2936_s9, %s2935_s16  }
  0x30   : > { %s353_s23 = sshll.u32 %s345_s22, 4  ;;  %s341_s26 = sand.u32 1, %s2408_s10   ;;  %s354_s23 = int_to_ptr.vmem [resolvable:$true] %s353_s23 }
  0x31   : > { %s342_s25 = scalar_lea.sflag [#allocation8], %s341_s26  ;;  %365 = sbr.rel (%p2515_p8) target bundleno = 1051 (0x41b), region = 52 }
  0x32   : > { %2029 = dma.hbm_to_vmem [thread:$0]  (!%p2024_p2), %s352_s27, 1024, %s354_s23, %s342_s25, %s2936_s9, %s2936_s9, %s2935_s16  }
  0x33   : > { %s2592_s14 = sand.u32 (!%p2515_p8), 1, %s2392_s28  }
  0x34   : > { %s1591_s4 = sshll.u32 (!%p2515_p8), %s2592_s14, 6  ;;  %s368_s6 = scalar_lea.sflag (!%p2515_p8), [#allocation5], %s2592_s14 }
  0x35   : > { %s2596_s17 = scalar_lea.vmem (!%p2515_p8), [#allocation4], %s1591_s4 }
  0x36   : > { %2367 = dma.done.wait (%p2502_p4), %s368_s6, 1024  }
  0x37   : > { %2369 = vsyncadd (%p2502_p4), %s368_s6, 4294966272  ;;  %s377_s27 = sand.u32 1, %s2493_s11   ;;  %s2603_s18 = scalar_lea.vmem [#allocation7], %s1591_s4 }
  0x38   : > { %s378_s9 = scalar_lea.sflag [#allocation8], %s377_s27 }
  0x39   : > { %2371 = dma.done.wait (%p2502_p4), %s378_s9, 1024  }
  0x3a   : > { %2373 = vsyncadd (%p2502_p4), %s378_s9, 4294966272 }
  0x3b   : > { %2375 = dma.done.wait (%p63_p1), [#allocation8], 1024  }
  0x3c   : > { %2377 = vsyncadd (%p63_p1), [#allocation8], 4294966272 }
  0x3d   : > { %2379 = dma.done.wait (%p63_p1), [#allocation11], 2048  }
  0x3e   : > { %2381 = vsyncadd (%p63_p1), [#allocation11], 4294965248  ;;  %v1843_v0 = vld [vmem:[#allocation10 + $0x38] sm:$0xff]  ;;  %v1842_v1 = vld [vmem:[#allocation10 + $0x30] sm:$0xff]  ;;  %s1596_s19 = sshll.u32 %s2592_s14, 7  ;;  %s1884_s20 = sshll.u32 %s2400_s30, 7 }
  0x3f   : > { %1980 = vmatpush.bf16.msra.mxu2 %v1843_v0  ;;  %573 = vmatpush.bf16.msra.mxu0 %v1843_v0  ;;  %v1841_v2 = vld [vmem:[#allocation10 + $0x28] sm:$0xff]  ;;  %v1840_v3 = vld [vmem:[#allocation10 + $0x20] sm:$0xff]  ;;  %v1839_v4 = vld [vmem:[#allocation10 + $0x18] sm:$0xff]  ;;  %s2841_s12 = scalar_lea.vmem [#allocation13], %s1596_s19  ;;  %s1435_s26 = scalar_lea.hbm %s2909_s8, %s1884_s20 }
  0x40   : > { %1979 = vmatpush.bf16.msra.mxu1 %v1843_v0  ;;  %v1838_v5 = vld [vmem:[#allocation10 + $0x10] sm:$0xff]  ;;  %v1837_v6 = vld [vmem:[#allocation10 + $0x8] sm:$0xff]  ;;  %v1836_v7 = vld [vmem:[#allocation10] sm:$0xff]  ;;  %s1436_s25 = sshll.u32 %s2841_s12, 4  ;;  %s1438_s4 = sshll.u32 %s1435_s26, 4  ;;  %s1437_s25 = int_to_ptr.vmem [resolvable:$true] %s1436_s25  ;;  %s1439_s4 = int_to_ptr.hbm [resolvable:$true] %s1438_s4 }
  0x41   : > { %v2618_v8 = vld [vmem:[%s2603_s18 + $0x28] sm:$0xff]  ;;  %v2622_v9 = vld [vmem:[%s2603_s18] sm:$0xff]  ;;  %v2625_v10 = vld [vmem:[%s2603_s18 + $0x18] sm:$0xff]  ;;  %s1422_s6 = scalar_lea.sflag [#allocation6], %s2592_s14 }
  0x42   : > { %v1867_v11 = vld [vmem:[#allocation9 + $0x38] sm:$0xff]  ;;  %v1866_v12 = vld [vmem:[#allocation9 + $0x30] sm:$0xff]  ;;  %v1865_v13 = vld [vmem:[#allocation9 + $0x28] sm:$0xff] }
  0x43   : > { %1982 = vmatpush.bf16.msra.mxu2 %v1842_v1  ;;  %574 = vmatpush.bf16.msra.mxu0 %v1842_v1  ;;  %v1864_v14 = vld [vmem:[#allocation9 + $0x20] sm:$0xff]  ;;  %v2630_v15 = vld [vmem:[%s2603_s18 + $0x30] sm:$0xff]  ;;  %v2633_v16 = vld [vmem:[%s2603_s18 + $0x8] sm:$0xff] }
  0x44   : > { %1981 = vmatpush.bf16.msra.mxu1 %v1842_v1  ;;  %v2636_v17 = vld [vmem:[%s2603_s18 + $0x20] sm:$0xff]  ;;  %v1863_v18 = vld [vmem:[#allocation9 + $0x18] sm:$0xff]  ;;  %v1862_v19 = vld [vmem:[#allocation9 + $0x10] sm:$0xff] }
  0x45   : > { %v1861_v20 = vld [vmem:[#allocation9 + $0x8] sm:$0xff]  ;;  %v1860_v21 = vld [vmem:[#allocation9] sm:$0xff]  ;;  %v2642_v22 = vld [vmem:[%s2603_s18 + $0x38] sm:$0xff] }
  0x46   : > { %v2645_v23 = vld [vmem:[%s2603_s18 + $0x10] sm:$0xff]  ;;  %v1852_v24 = vld [vmem:[%s2596_s17] sm:$0xff]  ;;  %v1853_v25 = vld [vmem:[%s2596_s17 + $0x8] sm:$0xff]  ;;  %s2334_s18 = scalar_lea.hbm %s2909_s8, 256 }
  0x47   : > { %1984 = vmatpush.bf16.msra.mxu2 %v1841_v2  ;;  %575 = vmatpush.bf16.msra.mxu0 %v1841_v2  ;;  %v1854_v26 = vld [vmem:[%s2596_s17 + $0x10] sm:$0xff]  ;;  %v1855_v27 = vld [vmem:[%s2596_s17 + $0x18] sm:$0xff]  ;;  %v1856_v31 = vld [vmem:[%s2596_s17 + $0x20] sm:$0xff] }
  0x48   : > { %1983 = vmatpush.bf16.msra.mxu1 %v1841_v2  ;;  %v2097_v32 = vld [vmem:[%s2906_s5] ss:$0 sm:$0xff] }
  0x4b   : > { %1986 = vmatpush.bf16.msra.mxu2 %v1840_v3  ;;  %576 = vmatpush.bf16.msra.mxu0 %v1840_v3 }
  0x4c   : > { %1985 = vmatpush.bf16.msra.mxu1 %v1840_v3 }
  0x4f   : > { %1988 = vmatpush.bf16.msra.mxu2 %v1839_v4  ;;  %577 = vmatpush.bf16.msra.mxu0 %v1839_v4 }
  0x50   : > { %1987 = vmatpush.bf16.msra.mxu1 %v1839_v4 }
  0x53   : > { %1990 = vmatpush.bf16.msra.mxu2 %v1838_v5  ;;  %578 = vmatpush.bf16.msra.mxu0 %v1838_v5 }
  0x54   : > { %1989 = vmatpush.bf16.msra.mxu1 %v1838_v5 }
  0x57   : > { %1992 = vmatpush.bf16.msra.mxu2 %v1837_v6  ;;  %579 = vmatpush.bf16.msra.mxu0 %v1837_v6 }
  0x58   : > { %1991 = vmatpush.bf16.msra.mxu1 %v1837_v6 }
  0x5b   : > { %1994 = vmatpush.bf16.msra.mxu2 %v1836_v7  ;;  %580 = vmatpush.bf16.msra.mxu0 %v1836_v7 }
  0x5c   : > { %1993 = vmatpush.bf16.msra.mxu1 %v1836_v7  ;;  %v1851_v7 = vld [vmem:[#allocation12 + $0x38] sm:$0xff] }
  0x5e   : > { %606 = vmatmul.bf16.vlgmr.msra.gmra.mxu2 %v2618_v8  ;;  %581 = vmatmul.bf16.vlgmr.msra.gmra.mxu0 %v2622_v9 }
  0x5f   : > { %596 = vmatmul.bf16.vlgmr.msra.gmra.mxu1 %v2625_v10  ;;  %935 = vmatpush.bf16.msrb.mxu2 %v1867_v11  ;;  %v1850_v11 = vld [vmem:[#allocation12 + $0x30] sm:$0xff] }
  0x60   : > { %690 = vmatpush.bf16.msrb.mxu1 %v1851_v7 }
  0x63   : > { %936 = vmatpush.bf16.msrb.mxu2 %v1866_v12 }
  0x64   : > { %691 = vmatpush.bf16.msrb.mxu1 %v1850_v11 }
  0x67   : > { %937 = vmatpush.bf16.msrb.mxu2 %v1865_v13  ;;  %v1849_v13 = vld [vmem:[#allocation12 + $0x28] sm:$0xff] }
  0x68   : > { %692 = vmatpush.bf16.msrb.mxu1 %v1849_v13  ;;  %v1121_v13 = vlaneseq }
  0x6b   : > { %938 = vmatpush.bf16.msrb.mxu2 %v1864_v14  ;;  %v1857_v14 = vld [vmem:[%s2596_s17 + $0x28] sm:$0xff] }
  0x6e   : > { %611 = vmatmul.bf16.gmra.mxu2 %v2630_v15  ;;  %586 = vmatmul.bf16.gmra.mxu0 %v2633_v16 }
  0x6f   : > { %601 = vmatmul.bf16.gmra.mxu1 %v2636_v17  ;;  %939 = vmatpush.bf16.msrb.mxu2 %v1863_v18  ;;  %v1848_v18 = vld [vmem:[#allocation12 + $0x20] sm:$0xff] }
  0x70   : > { %693 = vmatpush.bf16.msrb.mxu1 %v1848_v18 }
  0x73   : > { %940 = vmatpush.bf16.msrb.mxu2 %v1862_v19 }
  0x77   : > { %941 = vmatpush.bf16.msrb.mxu2 %v1861_v20  ;;  %v1847_v20 = vld [vmem:[#allocation12 + $0x18] sm:$0xff] }
  0x78   : > { %694 = vmatpush.bf16.msrb.mxu1 %v1847_v20  ;;  %v2680_v20 = vand.u32 127, %v1121_v13 }
  0x7a   : > { %vm1123_vm0 = vcmp.lt.s32.totalorder %v2680_v20, 8 }
  0x7b   : > { %942 = vmatpush.bf16.msrb.mxu2 %v1860_v21  ;;  %v1846_v21 = vld [vmem:[#allocation12 + $0x10] sm:$0xff] }
  0x7c   : > { %695 = vmatpush.bf16.msrb.mxu1 %v1846_v21 }
  0x7e   : > { %616 = vmatmul.bf16.gmra.mxu2 %v2642_v22  ;;  %591 = vmatmul.bf16.gmra.mxu0 %v2645_v23 }
  0x8e   : > { %943 = vmatmul.bf16.vlgmr.msrb.gmra.mxu2 %v1852_v24 }
  0x9e   : > { %948 = vmatmul.bf16.gmra.mxu2 %v1853_v25  ;;  %v1845_v25 = vld [vmem:[#allocation12 + $0x8] sm:$0xff] }
  0x9f   : > { %696 = vmatpush.bf16.msrb.mxu1 %v1845_v25 }
  0xae   : > { %953 = vmatmul.bf16.gmra.mxu2 %v1854_v26  ;;  %v1858_v26 = vld [vmem:[%s2596_s17 + $0x30] sm:$0xff] }
  0xbe   : > { %958 = vmatmul.bf16.gmra.mxu2 %v1855_v27 }
  0xce   : > { %963 = vmatmul.bf16.gmra.mxu2 %v1856_v31 }
  0xdb   : > { %v582_v28 = vpop.f32.mrf.mxu0 }
  0xdc   : > { %v597_v29 = vpop.f32.mrf.mxu1  ;;  %v583_v33 = vadd.f32 %v2097_v32, %v582_v28 }
  0xdd   : > { %v598_v34 = vadd.f32 %v2097_v32, %v597_v29  ;;  %v1844_v29 = vld [vmem:[#allocation12] sm:$0xff] }
  0xde   : > { %968 = vmatmul.bf16.gmra.mxu2 %v1857_v14  ;;  %697 = vmatpush.bf16.msrb.mxu1 %v1844_v29 }
  0xe1   : > { %v607_v30 = vpop.f32.mrf.mxu2  ;;  %698 = vmatmul.bf16.vlgmr.msrb.gmra.mxu1 %v2622_v9 }
  0xe2   : > { %v608_v42 = vadd.f32 %v2097_v32, %v607_v30 }
  0xe3   : > { %v584_v35 = vpop.f32.mrf.mxu0 }
  0xe4   : > { %v599_v36 = vpop.f32.mrf.mxu1  ;;  %v585_v37 = vadd.f32 %v2097_v32, %v584_v35  ;;  %v2098_v35 = vld [vmem:[%s2904_s3] ss:$0 sm:$0xff] }
  0xe5   : > { %v600_v38 = vadd.f32 %v2097_v32, %v599_v36 }
  0xe6   : > { %v1888_v40 = vpack.c.bf16 %v585_v37, %v583_v33 }
  0xe7   : > { %v1903_v41 = vpack.c.bf16 %v600_v38, %v598_v34 }
  0xe8   : > { %1889 = vst [vmem:[#allocation2 + $0x30] sm:$0xff] %v1888_v40  }
  0xe9   : > { %v609_v39 = vpop.f32.mrf.mxu2  ;;  %1967 = vst [vmem:[#allocation2 + $0x10] sm:$0xff] %v1903_v41  }
  0xea   : > { %v610_v43 = vadd.f32 %v2097_v32, %v609_v39 }
  0xeb   : > { %v587_v45 = vpop.f32.mrf.mxu0 }
  0xec   : > { %v1913_v44 = vpack.c.bf16 %v610_v43, %v608_v42  ;;  %v602_v46 = vpop.f32.mrf.mxu1  ;;  %v588_v48 = vadd.f32 %v2097_v32, %v587_v45 }
  0xed   : > { %v603_v49 = vadd.f32 %v2097_v32, %v602_v46 }
  0xee   : > { %1969 = vst [vmem:[#allocation2 + $0x20] sm:$0xff] %v1913_v44   ;;  %973 = vmatmul.bf16.gmra.mxu2 %v1858_v26 }
  0xef   : > { %v1868_v36 = vld [vmem:[#allocation2 + $0x30] sm:$0xff] }
  0xf0   : > { %v1871_v28 = vld [vmem:[#allocation2 + $0x10] sm:$0xff] }
  0xf1   : > { %v612_v47 = vpop.f32.mrf.mxu2  ;;  %703 = vmatmul.bf16.gmra.mxu1 %v2633_v16 }
  0xf2   : > { %v613_v55 = vadd.f32 %v2097_v32, %v612_v47 }
  0xf3   : > { %v589_v50 = vpop.f32.mrf.mxu0 }
  0xf4   : > { %v604_v51 = vpop.f32.mrf.mxu1  ;;  %v590_v52 = vadd.f32 %v2097_v32, %v589_v50 }
  0xf5   : > { %v605_v53 = vadd.f32 %v2097_v32, %v604_v51  ;;  %v1873_v19 = vld [vmem:[#allocation2 + $0x20] sm:$0xff] }
  0xf6   : > { %v1893_v57 = vpack.c.bf16 %v590_v52, %v588_v48 }
  0xf7   : > { %v1908_v58 = vpack.c.bf16 %v605_v53, %v603_v49 }
  0xf8   : > { %1965 = vst [vmem:[#allocation2] sm:$0xff] %v1893_v57  }
  0xf9   : > { %v614_v54 = vpop.f32.mrf.mxu2  ;;  %1968 = vst [vmem:[#allocation2 + $0x8] sm:$0xff] %v1908_v58  }
  0xfa   : > { %v615_v56 = vadd.f32 %v2097_v32, %v614_v54 }
  0xfb   : > { %v592_v60 = vpop.f32.mrf.mxu0 }
  0xfc   : > { %v1918_v59 = vpack.c.bf16 %v615_v56, %v613_v55  ;;  %v593_v62 = vadd.f32 %v2097_v32, %v592_v60 }
  0xfe   : > { %1970 = vst [vmem:[#allocation2 + $0x28] sm:$0xff] %v1918_v59  }
  0xff   : > { %v1869_v33 = vld [vmem:[#allocation2] sm:$0xff] }
 0x100   : > { %v1872_v24 = vld [vmem:[#allocation2 + $0x8] sm:$0xff] }
 0x101   : > { %v617_v61 = vpop.f32.mrf.mxu2  ;;  %708 = vmatmul.bf16.gmra.mxu1 %v2645_v23 }
 0x102   : > { %v618_v2 = vadd.f32 %v2097_v32, %v617_v61 }
 0x103   : > { %v594_v63 = vpop.f32.mrf.mxu0 }
 0x104   : > { %v595_v0 = vadd.f32 %v2097_v32, %v594_v63 }
 0x105   : > { %v1874_v12 = vld [vmem:[#allocation2 + $0x28] sm:$0xff] }
 0x106   : > { %v1898_v4 = vpack.c.bf16 %v595_v0, %v593_v62 }
 0x108   : > { %1966 = vst [vmem:[#allocation2 + $0x18] sm:$0xff] %v1898_v4  }
 0x109   : > { %v619_v1 = vpop.f32.mrf.mxu2 }
 0x10a   : > { %v620_v3 = vadd.f32 %v2097_v32, %v619_v1  ;;  %v1859_v32 = vld [vmem:[%s2596_s17 + $0x38] sm:$0xff]  ;;  %s2328_s17 = sshra.s32 %s1439_s4, 4  ;;  %s2329_s17 = int_to_ptr.hbm [resolvable:$true] %s2328_s17 }
 0x10b   : > { %978 = vmatmul.bf16.gmra.mxu2 %v1859_v32  ;;  %s2330_s27 = scalar_lea.hbm %s2329_s17, 128  ;;  %p2335_p10 = scmp.lt.s32.totalorder %s2329_s17, %s2909_s8 }
 0x10c   : > { %v1923_v5 = vpack.c.bf16 %v620_v3, %v618_v2  ;;  %p2331_p1 = scmp.ne.s32.totalorder %s2329_s17, %s2330_s27  ;;  %p2336_p12 = scmp.lt.s32.totalorder %s2334_s18, %s2330_s27 }
 0x10e   : > { %1971 = vst [vmem:[#allocation2 + $0x38] sm:$0xff] %v1923_v5   ;;  %p2332_p4 = pnand %p2331_p1, %p2562_p5  ;;  %p2337_p13 = por %p2336_p12, %p2335_p10 }
 0x10f   : > { %v1870_v30 = vld [vmem:[#allocation2 + $0x18] sm:$0xff] }
 0x110   : > { %p2333_p8 = pneg %p2332_p4 }
 0x111   : > { %v944_v27 = vpop.f32.mrf.mxu2  ;;  %713 = vmatmul.bf16.gmra.mxu1 %v2625_v10 }
 0x112   : > { %v945_v37 = vadd.f32 %v2098_v35, %v944_v27  ;;  %p2338_p0 = pnand %p2337_p13, %p2333_p8 }
 0x115   : > { %v1875_v6 = vld [vmem:[#allocation2 + $0x38] sm:$0xff] }
 0x116   : > { %1056 = vmatpush.bf16.xpose.msra.mxu3 %v1875_v6 }
 0x119   : > { %v946_v31 = vpop.f32.mrf.mxu2 }
 0x11a   : > { %v947_v38 = vadd.f32 %v2098_v35, %v946_v31 }
 0x11c   : > { %v984_v9 = vpack.c.bf16 %v947_v38, %v945_v37 }
 0x11e   : > { %1057 = vmatpush.bf16.xpose.msra.mxu3 %v1874_v12 }
 0x121   : > { %v949_v34 = vpop.f32.mrf.mxu2  ;;  %718 = vmatmul.bf16.gmra.mxu1 %v2636_v17 }
 0x122   : > { %v950_v41 = vadd.f32 %v2098_v35, %v949_v34 }
 0x126   : > { %1058 = vmatpush.bf16.xpose.msra.mxu3 %v1873_v19 }
 0x129   : > { %v951_v39 = vpop.f32.mrf.mxu2 }
 0x12a   : > { %v952_v42 = vadd.f32 %v2098_v35, %v951_v39 }
 0x12c   : > { %v985_v43 = vpack.c.bf16 %v952_v42, %v950_v41 }
 0x12e   : > { %1059 = vmatpush.bf16.xpose.msra.mxu3 %v1872_v24 }
 0x131   : > { %v954_v40 = vpop.f32.mrf.mxu2  ;;  %723 = vmatmul.bf16.gmra.mxu1 %v2618_v8  ;;  %v2674_v8 = vld [vmem:[%s2908_s7] ss:$0 sm:$0xff] }
 0x132   : > { %v955_v45 = vadd.f32 %v2098_v35, %v954_v40 }
 0x136   : > { %1060 = vmatpush.bf16.xpose.msra.mxu3 %v1871_v28 }
 0x139   : > { %v956_v44 = vpop.f32.mrf.mxu2 }
 0x13a   : > { %v957_v46 = vadd.f32 %v2098_v35, %v956_v44 }
 0x13c   : > { %v986_v47 = vpack.c.bf16 %v957_v46, %v955_v45 }
 0x13e   : > { %1061 = vmatpush.bf16.xpose.msra.mxu3 %v1870_v30 }
 0x141   : > { %v959_v16 = vpop.f32.mrf.mxu2  ;;  %728 = vmatmul.bf16.gmra.mxu1 %v2630_v15 }
 0x142   : > { %v960_v49 = vadd.f32 %v2098_v35, %v959_v16 }
 0x146   : > { %1062 = vmatpush.bf16.xpose.msra.mxu3 %v1869_v33 }
 0x149   : > { %v961_v48 = vpop.f32.mrf.mxu2 }
 0x14a   : > { %v962_v50 = vadd.f32 %v2098_v35, %v961_v48 }
 0x14c   : > { %v987_v52 = vpack.c.bf16 %v962_v50, %v960_v49 }
 0x14e   : > { %1063 = vmatpush.bf16.xpose.msra.mxu3 %v1868_v36 }
 0x151   : > { %v964_v51 = vpop.f32.mrf.mxu2  ;;  %733 = vmatmul.bf16.gmra.mxu1 %v2642_v22 }
 0x152   : > { %v965_v53 = vadd.f32 %v2098_v35, %v964_v51 }
 0x155   : > { %1064 = vmatmul.bf16.vlgmr.msra.gmra.mxu3 %v984_v9 }
 0x159   : > { %v966_v23 = vpop.f32.mrf.mxu2 }
 0x15a   : > { %v967_v54 = vadd.f32 %v2098_v35, %v966_v23 }
 0x15c   : > { %v988_v55 = vpack.c.bf16 %v967_v54, %v965_v53 }
 0x15e   : > { %v699_v60 = vpop.f32.mrf.mxu1 }
 0x15f   : > { %v700_v15 = vadd.f32 %v2674_v8, %v699_v60 }
 0x161   : > { %v969_v10 = vpop.f32.mrf.mxu2 }
 0x162   : > { %v970_v56 = vadd.f32 %v2098_v35, %v969_v10 }
 0x165   : > { %1069 = vmatmul.bf16.gmra.mxu3 %v985_v43 }
 0x166   : > { %v701_v0 = vpop.f32.mrf.mxu1 }
 0x167   : > { %v702_v1 = vadd.f32 %v2674_v8, %v701_v0 }
 0x169   : > { %v971_v57 = vpop.f32.mrf.mxu2  ;;  %v1928_v2 = vpack.c.bf16 %v702_v1, %v700_v15 }
 0x16a   : > { %v972_v17 = vadd.f32 %v2098_v35, %v971_v57 }
 0x16b   : > { %1929 = vst [vmem:[#allocation3] sm:$0xff] %v1928_v2  }
 0x16c   : > { %v989_v58 = vpack.c.bf16 %v972_v17, %v970_v56 }
 0x16e   : > { %v704_v4 = vpop.f32.mrf.mxu1 }
 0x16f   : > { %v705_v11 = vadd.f32 %v2674_v8, %v704_v4 }
 0x171   : > { %v974_v59 = vpop.f32.mrf.mxu2 }
 0x172   : > { %v975_v62 = vadd.f32 %v2098_v35, %v974_v59 }
 0x175   : > { %1074 = vmatmul.bf16.gmra.mxu3 %v986_v47 }
 0x176   : > { %v706_v12 = vpop.f32.mrf.mxu1 }
 0x177   : > { %v707_v14 = vadd.f32 %v2674_v8, %v706_v12 }
 0x179   : > { %v976_v61 = vpop.f32.mrf.mxu2  ;;  %v1933_v19 = vpack.c.bf16 %v707_v14, %v705_v11 }
 0x17a   : > { %v977_v63 = vadd.f32 %v2098_v35, %v976_v61 }
 0x17b   : > { %1972 = vst [vmem:[#allocation3 + $0x18] sm:$0xff] %v1933_v19  }
 0x17c   : > { %v990_v22 = vpack.c.bf16 %v977_v63, %v975_v62 }
 0x17e   : > { %v709_v21 = vpop.f32.mrf.mxu1 }
 0x17f   : > { %v710_v27 = vadd.f32 %v2674_v8, %v709_v21 }
 0x185   : > { %1079 = vmatmul.bf16.gmra.mxu3 %v987_v52 }
 0x186   : > { %v711_v28 = vpop.f32.mrf.mxu1 }
 0x187   : > { %v712_v30 = vadd.f32 %v2674_v8, %v711_v28 }
 0x189   : > { %v1938_v32 = vpack.c.bf16 %v712_v30, %v710_v27 }
 0x18b   : > { %1973 = vst [vmem:[#allocation3 + $0x10] sm:$0xff] %v1938_v32  }
 0x18e   : > { %v979_v3 = vpop.f32.mrf.mxu2  ;;  %v714_v34 = vpop.f32.mrf.mxu1 }
 0x18f   : > { %v980_v6 = vadd.f32 %v2098_v35, %v979_v3  ;;  %v715_v38 = vadd.f32 %v2674_v8, %v714_v34 }
 0x192   : > { %v1878_v28 = vld [vmem:[#allocation3 + $0x10] sm:$0xff] }
 0x195   : > { %1084 = vmatmul.bf16.gmra.mxu3 %v988_v55 }
 0x196   : > { %v981_v5 = vpop.f32.mrf.mxu2  ;;  %v716_v39 = vpop.f32.mrf.mxu1 }
 0x197   : > { %v982_v7 = vadd.f32 %v2098_v35, %v981_v5  ;;  %v717_v40 = vadd.f32 %v2674_v8, %v716_v39 }
 0x199   : > { %v991_v18 = vpack.c.bf16 %v982_v7, %v980_v6  ;;  %v1943_v42 = vpack.c.bf16 %v717_v40, %v715_v38 }
 0x19b   : > { %1974 = vst [vmem:[#allocation3 + $0x20] sm:$0xff] %v1943_v42  }
 0x19e   : > { %v719_v44 = vpop.f32.mrf.mxu1 }
 0x19f   : > { %v720_v47 = vadd.f32 %v2674_v8, %v719_v44 }
 0x1a2   : > { %v1879_v19 = vld [vmem:[#allocation3 + $0x20] sm:$0xff] }
 0x1a5   : > { %1089 = vmatmul.bf16.gmra.mxu3 %v989_v58 }
 0x1a6   : > { %v721_v48 = vpop.f32.mrf.mxu1 }
 0x1a7   : > { %v722_v50 = vadd.f32 %v2674_v8, %v721_v48 }
 0x1a9   : > { %v1948_v52 = vpack.c.bf16 %v722_v50, %v720_v47 }
 0x1ab   : > { %1975 = vst [vmem:[#allocation3 + $0x28] sm:$0xff] %v1948_v52  }
 0x1ae   : > { %v724_v53 = vpop.f32.mrf.mxu1 }
 0x1af   : > { %v725_v56 = vadd.f32 %v2674_v8, %v724_v53 }
 0x1b5   : > { %1094 = vmatmul.bf16.gmra.mxu3 %v990_v22 }
 0x1b6   : > { %v726_v57 = vpop.f32.mrf.mxu1 }
 0x1b7   : > { %v727_v58 = vadd.f32 %v2674_v8, %v726_v57 }
 0x1b9   : > { %v1953_v60 = vpack.c.bf16 %v727_v58, %v725_v56 }
 0x1bb   : > { %1976 = vst [vmem:[#allocation3 + $0x8] sm:$0xff] %v1953_v60  }
 0x1be   : > { %v729_v62 = vpop.f32.mrf.mxu1 }
 0x1bf   : > { %v730_v1 = vadd.f32 %v2674_v8, %v729_v62 }
 0x1c2   : > { %v1881_v14 = vld [vmem:[#allocation3 + $0x8] sm:$0xff] }
 0x1c5   : > { %1099 = vmatmul.bf16.gmra.mxu3 %v991_v18  ;;  %v1880_v18 = vld [vmem:[#allocation3 + $0x28] sm:$0xff] }
 0x1c6   : > { %v731_v22 = vpop.f32.mrf.mxu1 }
 0x1c7   : > { %v732_v2 = vadd.f32 %v2674_v8, %v731_v22 }
 0x1c9   : > { %v1958_v3 = vpack.c.bf16 %v732_v2, %v730_v1 }
 0x1cb   : > { %1977 = vst [vmem:[#allocation3 + $0x30] sm:$0xff] %v1958_v3  }
 0x1ce   : > { %v734_v4 = vpop.f32.mrf.mxu1 }
 0x1cf   : > { %v735_v5 = vadd.f32 %v2674_v8, %v734_v4 }
 0x1d2   : > { %v1882_v13 = vld [vmem:[#allocation3 + $0x30] sm:$0xff] }
 0x1d6   : > { %v736_v6 = vpop.f32.mrf.mxu1 }
 0x1d7   : > { %v737_v7 = vadd.f32 %v2674_v8, %v736_v6  ;;  %v1877_v8 = vld [vmem:[#allocation3 + $0x18] sm:$0xff] }
 0x1d8   : > { %v1065_v24 = vpop.f32.mrf.mxu3 }
 0x1d9   : > { %v1105_v25 = vmul.f32 0.17677669, %v1065_v24  ;;  %v1963_v11 = vpack.c.bf16 %v737_v7, %v735_v5 }
 0x1db   : > { %v2685_v26 = vsel %vm1123_vm0, %v1105_v25, -1e+30  ;;  %1978 = vst [vmem:[#allocation3 + $0x38] sm:$0xff] %v1963_v11  }
 0x1dc   : > { %1140 = vmax.xlane.f32.xlu0 %v2685_v26 }
 0x1e0   : > { %v1067_v29 = vpop.f32.mrf.mxu3 }
 0x1e1   : > { %v1106_v31 = vmul.f32 0.17677669, %v1067_v29 }
 0x1e2   : > { %v1883_v12 = vld [vmem:[#allocation3 + $0x38] sm:$0xff] }
 0x1e3   : > { %v2692_v33 = vsel %vm1123_vm0, %v1106_v31, -1e+30  ;;  %1356 = vmatpush.bf16.msrb.mxu0 %v1883_v12 }
 0x1e4   : > { %1142 = vmax.xlane.f32.xlu0 %v2692_v33 }
 0x1e7   : > { %1357 = vmatpush.bf16.msrb.mxu0 %v1882_v13 }
 0x1e8   : > { %v1070_v35 = vpop.f32.mrf.mxu3 }
 0x1e9   : > { %v1107_v36 = vmul.f32 0.17677669, %v1070_v35  ;;  %v1876_v35 = vld [vmem:[#allocation3] sm:$0xff] }
 0x1eb   : > { %v2697_v37 = vsel %vm1123_vm0, %v1107_v36, -1e+30  ;;  %1358 = vmatpush.bf16.msrb.mxu0 %v1881_v14 }
 0x1ec   : > { %1144 = vmax.xlane.f32.xlu1 %v2697_v37 }
 0x1ef   : > { %1359 = vmatpush.bf16.msrb.mxu0 %v1880_v18 }
 0x1f0   : > { %v1072_v9 = vpop.f32.mrf.mxu3 }
 0x1f1   : > { %v1108_v41 = vmul.f32 0.17677669, %v1072_v9 }
 0x1f3   : > { %v2704_v43 = vsel %vm1123_vm0, %v1108_v41, -1e+30  ;;  %1360 = vmatpush.bf16.msrb.mxu0 %v1879_v19 }
 0x1f4   : > { %1146 = vmax.xlane.f32.xlu1 %v2704_v43 }
 0x1f7   : > { %1361 = vmatpush.bf16.msrb.mxu0 %v1878_v28 }
 0x1f8   : > { %v1075_v16 = vpop.f32.mrf.mxu3 }
 0x1f9   : > { %v1109_v45 = vmul.f32 0.17677669, %v1075_v16 }
 0x1fb   : > { %v2709_v46 = vsel %vm1123_vm0, %v1109_v45, -1e+30  ;;  %1362 = vmatpush.bf16.msrb.mxu0 %v1877_v8 }
 0x1fc   : > { %1148 = vmax.xlane.f32.xlu2 %v2709_v46 }
 0x1ff   : > { %1363 = vmatpush.bf16.msrb.mxu0 %v1876_v35 }
 0x200   : > { %v1077_v49 = vpop.f32.mrf.mxu3 }
 0x201   : > { %v1110_v51 = vmul.f32 0.17677669, %v1077_v49 }
 0x203   : > { %v2716_v23 = vsel %vm1123_vm0, %v1110_v51, -1e+30 }
 0x204   : > { %1150 = vmax.xlane.f32.xlu2 %v2716_v23 }
 0x208   : > { %v1080_v54 = vpop.f32.mrf.mxu3 }
 0x209   : > { %v1111_v55 = vmul.f32 0.17677669, %v1080_v54 }
 0x20b   : > { %v2721_v10 = vsel %vm1123_vm0, %v1111_v55, -1e+30 }
 0x20c   : > { %1152 = vmax.xlane.f32.xlu0 %v2721_v10 }
 0x210   : > { %v1082_v17 = vpop.f32.mrf.mxu3 }
 0x211   : > { %v1112_v59 = vmul.f32 0.17677669, %v1082_v17 }
 0x213   : > { %v2728_v61 = vsel %vm1123_vm0, %v1112_v59, -1e+30 }
 0x214   : > { %1154 = vmax.xlane.f32.xlu1 %v2728_v61 }
 0x218   : > { %v1085_v63 = vpop.f32.mrf.mxu3 }
 0x219   : > { %v1113_v15 = vmul.f32 0.17677669, %v1085_v63 }
 0x21b   : > { %v2733_v0 = vsel %vm1123_vm0, %v1113_v15, -1e+30 }
 0x21c   : > { %1156 = vmax.xlane.f32.xlu1 %v2733_v0 }
 0x220   : > { %v1087_v24 = vpop.f32.mrf.mxu3 }
 0x221   : > { %v1114_v36 = vmul.f32 0.17677669, %v1087_v24 }
 0x228   : > { %v1090_v31 = vpop.f32.mrf.mxu3 }
 0x229   : > { %v1115_v41 = vmul.f32 0.17677669, %v1090_v31 }
 0x22b   : > { %v2759_v45 = vsel %vm1123_vm0, %v1115_v41, -1e+30 }
 0x230   : > { %v1092_v40 = vpop.f32.mrf.mxu3 }
 0x231   : > { %v1116_v48 = vmul.f32 0.17677669, %v1092_v40 }
 0x233   : > { %v2768_v52 = vsel %vm1123_vm0, %v1116_v48, -1e+30 }
 0x238   : > { %v1095_v47 = vpop.f32.mrf.mxu3 }
 0x239   : > { %v1117_v53 = vmul.f32 0.17677669, %v1095_v47 }
 0x23b   : > { %v2777_v17 = vsel %vm1123_vm0, %v1117_v53, -1e+30 }
 0x240   : > { %v1097_v54 = vpop.f32.mrf.mxu3 }
 0x241   : > { %v1118_v58 = vmul.f32 0.17677669, %v1097_v54 }
 0x243   : > { %v2786_v15 = vsel %vm1123_vm0, %v1118_v58, -1e+30 }
 0x248   : > { %v1100_v62 = vpop.f32.mrf.mxu3 }
 0x249   : > { %v1119_v1 = vmul.f32 0.17677669, %v1100_v62 }
 0x24b   : > { %v2795_v4 = vsel %vm1123_vm0, %v1119_v1, -1e+30 }
 0x24f   : > { %v1141_v21 = vpop.xlane.xlu0 %1140 }
 0x250   : > { %v1172_v25 = vsub.f32 %v2685_v26, %v1141_v21  ;;  %v1102_v5 = vpop.f32.mrf.mxu3 }
 0x251   : > { %v1120_v6 = vmul.f32 0.17677669, %v1102_v5 }
 0x252   : > { %v1188_v27 = vmul.f32 1.442695, %v1172_v25 }
 0x253   : > { %v2804_v13 = vsel %vm1123_vm0, %v1120_v6, -1e+30 }
 0x254   : > { %2100 = vpow2.f32 %v1188_v27 }
 0x257   : > { %v1143_v29 = vpop.xlane.xlu0 %1142 }
 0x258   : > { %v1173_v30 = vsub.f32 %v2692_v33, %v1143_v29  ;;  %v2750_v33 = vsel %vm1123_vm0, %v1114_v36, -1e+30 }
 0x25a   : > { %v2742_v32 = vpop.eup %2100  ;;  %v1190_v34 = vmul.f32 1.442695, %v1173_v30 }
 0x25b   : > { %1220 = vadd.xlane.f32.xlu2 %v2742_v32 }
 0x25c   : > { %2102 = vpow2.f32 %v1190_v34 }
 0x25f   : > { %v1145_v26 = vpop.xlane.xlu1 %1144 }
 0x260   : > { %v1174_v38 = vsub.f32 %v2697_v37, %v1145_v26 }
 0x262   : > { %v2746_v39 = vpop.eup %2102  ;;  %v1192_v9 = vmul.f32 1.442695, %v1174_v38 }
 0x263   : > { %1222 = vadd.xlane.f32.xlu0 %v2746_v39  ;;  %1158 = vmax.xlane.f32.xlu2 %v2750_v33 }
 0x264   : > { %2104 = vpow2.f32 %v1192_v9 }
 0x267   : > { %v1147_v42 = vpop.xlane.xlu1 %1146 }
 0x268   : > { %v1175_v44 = vsub.f32 %v2704_v43, %v1147_v42 }
 0x26a   : > { %v2755_v16 = vpop.eup %2104  ;;  %v1194_v37 = vmul.f32 1.442695, %v1175_v44 }
 0x26b   : > { %1224 = vadd.xlane.f32.xlu0 %v2755_v16  ;;  %1160 = vmax.xlane.f32.xlu2 %v2759_v45 }
 0x26c   : > { %2106 = vpow2.f32 %v1194_v37 }
 0x26f   : > { %v1149_v49 = vpop.xlane.xlu2 %1148 }
 0x270   : > { %v1176_v50 = vsub.f32 %v2709_v46, %v1149_v49 }
 0x272   : > { %v2764_v51 = vpop.eup %2106  ;;  %v1196_v43 = vmul.f32 1.442695, %v1176_v50 }
 0x273   : > { %1226 = vadd.xlane.f32.xlu1 %v2764_v51  ;;  %1162 = vmax.xlane.f32.xlu0 %v2768_v52 }
 0x274   : > { %2108 = vpow2.f32 %v1196_v43 }
 0x277   : > { %v1151_v55 = vpop.xlane.xlu2 %1150 }
 0x278   : > { %v1177_v56 = vsub.f32 %v2716_v23, %v1151_v55 }
 0x27a   : > { %v2773_v57 = vpop.eup %2108  ;;  %v1198_v46 = vmul.f32 1.442695, %v1177_v56 }
 0x27b   : > { %1228 = vadd.xlane.f32.xlu1 %v2773_v57  ;;  %1164 = vmax.xlane.f32.xlu0 %v2777_v17 }
 0x27c   : > { %2110 = vpow2.f32 %v1198_v46 }
 0x27f   : > { %v1153_v59 = vpop.xlane.xlu0 %1152 }
 0x280   : > { %v1178_v60 = vsub.f32 %v2721_v10, %v1153_v59 }
 0x282   : > { %v2782_v63 = vpop.eup %2110  ;;  %v1200_v23 = vmul.f32 1.442695, %v1178_v60 }
 0x283   : > { %1230 = vadd.xlane.f32.xlu2 %v2782_v63  ;;  %1166 = vmax.xlane.f32.xlu1 %v2786_v15 }
 0x284   : > { %2112 = vpow2.f32 %v1200_v23 }
 0x287   : > { %v1155_v22 = vpop.xlane.xlu1 %1154 }
 0x288   : > { %v1179_v2 = vsub.f32 %v2728_v61, %v1155_v22 }
 0x28a   : > { %v2791_v3 = vpop.eup %2112  ;;  %v1202_v10 = vmul.f32 1.442695, %v1179_v2 }
 0x28b   : > { %1232 = vadd.xlane.f32.xlu2 %v2791_v3  ;;  %1168 = vmax.xlane.f32.xlu1 %v2795_v4 }
 0x28c   : > { %2114 = vpow2.f32 %v1202_v10 }
 0x28f   : > { %v1157_v7 = vpop.xlane.xlu1 %1156 }
 0x290   : > { %v1180_v11 = vsub.f32 %v2733_v0, %v1157_v7 }
 0x292   : > { %v2800_v12 = vpop.eup %2114  ;;  %v1204_v61 = vmul.f32 1.442695, %v1180_v11 }
 0x293   : > { %1234 = vadd.xlane.f32.xlu0 %v2800_v12  ;;  %1170 = vmax.xlane.f32.xlu2 %v2804_v13 }
 0x294   : > { %2116 = vpow2.f32 %v1204_v61 }
 0x29a   : > { %v2808_v14 = vpop.eup %2116 }
 0x29b   : > { %1236 = vadd.xlane.f32.xlu0 %v2808_v14 }
 0x2ce   : > { %v1221_v18 = vpop.xlane.xlu2 %1220 }
 0x2cf   : > { %2118 = vrcp.f32 %v1221_v18 }
 0x2d5   : > { %v2119_v20 = vpop.eup %2118 }
 0x2d6   : > { %v1223_v19 = vpop.xlane.xlu0 %1222  ;;  %v1159_v0 = vpop.xlane.xlu2 %1158  ;;  %v1268_v8 = vmul.f32 %v2119_v20, %v2742_v32 }
 0x2d7   : > { %2120 = vrcp.f32 %v1223_v19  ;;  %v1181_v21 = vsub.f32 %v2750_v33, %v1159_v0 }
 0x2d9   : > { %v1206_v24 = vmul.f32 1.442695, %v1181_v21 }
 0x2db   : > { %2122 = vpow2.f32 %v1206_v24 }
 0x2dd   : > { %v2121_v25 = vpop.eup %2120 }
 0x2de   : > { %v1225_v27 = vpop.xlane.xlu0 %1224  ;;  %v1161_v28 = vpop.xlane.xlu2 %1160  ;;  %v1269_v29 = vmul.f32 %v2121_v25, %v2746_v39 }
 0x2df   : > { %v1182_v30 = vsub.f32 %v2759_v45, %v1161_v28 }
 0x2e0   : > { %v1284_v31 = vpack.c.bf16 %v1269_v29, %v1268_v8 }
 0x2e1   : > { %v2815_v34 = vpop.eup %2122  ;;  %v1208_v35 = vmul.f32 1.442695, %v1182_v30 }
 0x2e2   : > { %1364 = vmatmul.bf16.vlgmr.msrb.gmra.mxu0 %v1284_v31  ;;  %1238 = vadd.xlane.f32.xlu1 %v2815_v34 }
 0x2e3   : > { %2124 = vpow2.f32 %v1208_v35 }
 0x2e4   : > { %2126 = vrcp.f32 %v1225_v27 }
 0x2e6   : > { %v1227_v36 = vpop.xlane.xlu1 %1226  ;;  %v1163_v26 = vpop.xlane.xlu0 %1162 }
 0x2e7   : > { %2128 = vrcp.f32 %v1227_v36  ;;  %v1183_v38 = vsub.f32 %v2768_v52, %v1163_v26 }
 0x2e9   : > { %v2819_v9 = vpop.eup %2124  ;;  %v1210_v32 = vmul.f32 1.442695, %v1183_v38 }
 0x2ea   : > { %1240 = vadd.xlane.f32.xlu2 %v2819_v9  ;;  %v2127_v39 = vpop.eup %2126 }
 0x2eb   : > { %2130 = vpow2.f32 %v1210_v32  ;;  %v1270_v42 = vmul.f32 %v2127_v39, %v2755_v16 }
 0x2ed   : > { %v2129_v33 = vpop.eup %2128 }
 0x2ee   : > { %v1229_v40 = vpop.xlane.xlu1 %1228  ;;  %v1165_v41 = vpop.xlane.xlu0 %1164  ;;  %v1271_v44 = vmul.f32 %v2129_v33, %v2764_v51 }
 0x2ef   : > { %v1184_v37 = vsub.f32 %v2777_v17, %v1165_v41 }
 0x2f0   : > { %v1285_v45 = vpack.c.bf16 %v1271_v44, %v1270_v42 }
 0x2f1   : > { %v2825_v47 = vpop.eup %2130  ;;  %v1212_v48 = vmul.f32 1.442695, %v1184_v37 }
 0x2f2   : > { %1369 = vmatmul.bf16.gmra.mxu0 %v1285_v45  ;;  %1242 = vadd.xlane.f32.xlu0 %v2825_v47 }
 0x2f3   : > { %2132 = vpow2.f32 %v1212_v48 }
 0x2f4   : > { %2134 = vrcp.f32 %v1229_v40 }
 0x2f6   : > { %v1231_v49 = vpop.xlane.xlu2 %1230  ;;  %v1167_v50 = vpop.xlane.xlu1 %1166 }
 0x2f7   : > { %2136 = vrcp.f32 %v1231_v49  ;;  %v1185_v43 = vsub.f32 %v2786_v15, %v1167_v50 }
 0x2f9   : > { %v2829_v52 = vpop.eup %2132  ;;  %v1214_v16 = vmul.f32 1.442695, %v1185_v43 }
 0x2fa   : > { %1244 = vadd.xlane.f32.xlu1 %v2829_v52  ;;  %v2135_v51 = vpop.eup %2134 }
 0x2fb   : > { %2138 = vpow2.f32 %v1214_v16  ;;  %v1272_v56 = vmul.f32 %v2135_v51, %v2773_v57 }
 0x2fd   : > { %v2137_v53 = vpop.eup %2136 }
 0x2fe   : > { %v1233_v54 = vpop.xlane.xlu2 %1232  ;;  %v1169_v55 = vpop.xlane.xlu1 %1168  ;;  %v1273_v46 = vmul.f32 %v2137_v53, %v2782_v63 }
 0x2ff   : > { %v1186_v17 = vsub.f32 %v2795_v4, %v1169_v55 }
 0x300   : > { %v1286_v58 = vpack.c.bf16 %v1273_v46, %v1272_v56 }
 0x301   : > { %v2139_v59 = vpop.eup %2138  ;;  %v1216_v60 = vmul.f32 1.442695, %v1186_v17 }
 0x302   : > { %1374 = vmatmul.bf16.gmra.mxu0 %v1286_v58  ;;  %1246 = vadd.xlane.f32.xlu2 %v2139_v59 }
 0x303   : > { %2140 = vpow2.f32 %v1216_v60 }
 0x304   : > { %2142 = vrcp.f32 %v1233_v54 }
 0x306   : > { %v1235_v62 = vpop.xlane.xlu0 %1234  ;;  %v1171_v23 = vpop.xlane.xlu2 %1170 }
 0x307   : > { %2144 = vrcp.f32 %v1235_v62  ;;  %v1187_v15 = vsub.f32 %v2804_v13, %v1171_v23 }
 0x309   : > { %v2141_v1 = vpop.eup %2140  ;;  %v1218_v22 = vmul.f32 1.442695, %v1187_v15 }
 0x30a   : > { %1248 = vadd.xlane.f32.xlu0 %v2141_v1  ;;  %v2143_v57 = vpop.eup %2142 }
 0x30b   : > { %2146 = vpow2.f32 %v1218_v22  ;;  %v1274_v2 = vmul.f32 %v2143_v57, %v2791_v3 }
 0x30d   : > { %v2145_v63 = vpop.eup %2144 }
 0x30e   : > { %v1275_v10 = vmul.f32 %v2145_v63, %v2800_v12  ;;  %v1237_v6 = vpop.xlane.xlu0 %1236 }
 0x30f   : > { %2148 = vrcp.f32 %v1237_v6 }
 0x310   : > { %v1287_v4 = vpack.c.bf16 %v1275_v10, %v1274_v2 }
 0x311   : > { %v2147_v5 = vpop.eup %2146 }
 0x312   : > { %1379 = vmatmul.bf16.gmra.mxu0 %v1287_v4  ;;  %1250 = vadd.xlane.f32.xlu1 %v2147_v5 }
 0x315   : > { %v2149_v11 = vpop.eup %2148 }
 0x316   : > { %v1276_v13 = vmul.f32 %v2149_v11, %v2808_v14 }
 0x355   : > { %v1239_v7 = vpop.xlane.xlu1 %1238 }
 0x356   : > { %2150 = vrcp.f32 %v1239_v7 }
 0x35c   : > { %v2151_v61 = vpop.eup %2150 }
 0x35d   : > { %v1277_v18 = vmul.f32 %v2151_v61, %v2815_v34  ;;  %v1241_v3 = vpop.xlane.xlu2 %1240 }
 0x35e   : > { %2152 = vrcp.f32 %v1241_v3 }
 0x35f   : > { %v1365_v19 = vpop.f32.mrf.mxu0  ;;  %v1288_v0 = vpack.c.bf16 %v1277_v18, %v1276_v13 }
 0x360   : > { %1405 = vst [vmem:[%s2841_s12] sm:$0xff] %v1365_v19 }
 0x361   : > { %1384 = vmatmul.bf16.gmra.mxu0 %v1288_v0 }
 0x364   : > { %v2153_v24 = vpop.eup %2152 }
 0x365   : > { %v1243_v12 = vpop.xlane.xlu0 %1242  ;;  %v1278_v20 = vmul.f32 %v2153_v24, %v2819_v9 }
 0x366   : > { %2154 = vrcp.f32 %v1243_v12 }
 0x367   : > { %v1367_v21 = vpop.f32.mrf.mxu0 }
 0x368   : > { %1406 = vst [vmem:[%s2841_s12 + $0x8] sm:$0xff] %v1367_v21 }
 0x36c   : > { %v2155_v14 = vpop.eup %2154 }
 0x36d   : > { %v1279_v25 = vmul.f32 %v2155_v14, %v2825_v47  ;;  %v1245_v8 = vpop.xlane.xlu1 %1244 }
 0x36e   : > { %2156 = vrcp.f32 %v1245_v8 }
 0x36f   : > { %v1370_v27 = vpop.f32.mrf.mxu0  ;;  %v1289_v28 = vpack.c.bf16 %v1279_v25, %v1278_v20 }
 0x370   : > { %1407 = vst [vmem:[%s2841_s12 + $0x10] sm:$0xff] %v1370_v27 }
 0x371   : > { %1389 = vmatmul.bf16.gmra.mxu0 %v1289_v28 }
 0x374   : > { %v2157_v31 = vpop.eup %2156 }
 0x375   : > { %v1247_v29 = vpop.xlane.xlu2 %1246  ;;  %v1280_v35 = vmul.f32 %v2157_v31, %v2829_v52 }
 0x376   : > { %2158 = vrcp.f32 %v1247_v29 }
 0x377   : > { %v1372_v30 = vpop.f32.mrf.mxu0 }
 0x378   : > { %1408 = vst [vmem:[%s2841_s12 + $0x18] sm:$0xff] %v1372_v30 }
 0x37c   : > { %v2159_v34 = vpop.eup %2158 }
 0x37d   : > { %v1281_v36 = vmul.f32 %v2159_v34, %v2139_v59  ;;  %v1249_v9 = vpop.xlane.xlu0 %1248 }
 0x37e   : > { %2160 = vrcp.f32 %v1249_v9 }
 0x37f   : > { %v1375_v26 = vpop.f32.mrf.mxu0  ;;  %v1290_v38 = vpack.c.bf16 %v1281_v36, %v1280_v35 }
 0x380   : > { %1409 = vst [vmem:[%s2841_s12 + $0x20] sm:$0xff] %v1375_v26 }
 0x381   : > { %1394 = vmatmul.bf16.gmra.mxu0 %v1290_v38 }
 0x384   : > { %v2161_v33 = vpop.eup %2160 }
 0x385   : > { %v1251_v32 = vpop.xlane.xlu1 %1250  ;;  %v1282_v41 = vmul.f32 %v2161_v33, %v2141_v1 }
 0x386   : > { %2162 = vrcp.f32 %v1251_v32 }
 0x387   : > { %v1377_v39 = vpop.f32.mrf.mxu0 }
 0x388   : > { %1410 = vst [vmem:[%s2841_s12 + $0x28] sm:$0xff] %v1377_v39 }
 0x38c   : > { %v2163_v40 = vpop.eup %2162 }
 0x38d   : > { %v1283_v42 = vmul.f32 %v2163_v40, %v2147_v5 }
 0x38f   : > { %v1380_v44 = vpop.f32.mrf.mxu0  ;;  %v1291_v37 = vpack.c.bf16 %v1283_v42, %v1282_v41 }
 0x390   : > { %1411 = vst [vmem:[%s2841_s12 + $0x30] sm:$0xff] %v1380_v44 }
 0x391   : > { %1399 = vmatmul.bf16.gmra.mxu0 %v1291_v37 }
 0x397   : > { %v1382_v45 = vpop.f32.mrf.mxu0 }
 0x398   : > { %1412 = vst [vmem:[%s2841_s12 + $0x38] sm:$0xff] %v1382_v45 }
 0x3de   : > { %v1385_v47 = vpop.f32.mrf.mxu0 }
 0x3df   : > { %1413 = vst [vmem:[%s2841_s12 + $0x40] sm:$0xff] %v1385_v47 }
 0x3e6   : > { %v1387_v48 = vpop.f32.mrf.mxu0 }
 0x3e7   : > { %1414 = vst [vmem:[%s2841_s12 + $0x48] sm:$0xff] %v1387_v48 }
 0x3ee   : > { %v1390_v49 = vpop.f32.mrf.mxu0 }
 0x3ef   : > { %1415 = vst [vmem:[%s2841_s12 + $0x50] sm:$0xff] %v1390_v49 }
 0x3f6   : > { %v1392_v50 = vpop.f32.mrf.mxu0 }
 0x3f7   : > { %1416 = vst [vmem:[%s2841_s12 + $0x58] sm:$0xff] %v1392_v50 }
 0x3fe   : > { %v1395_v43 = vpop.f32.mrf.mxu0 }
 0x3ff   : > { %1417 = vst [vmem:[%s2841_s12 + $0x60] sm:$0xff] %v1395_v43 }
 0x406   : > { %v1397_v52 = vpop.f32.mrf.mxu0 }
 0x407   : > { %1418 = vst [vmem:[%s2841_s12 + $0x68] sm:$0xff] %v1397_v52 }
 0x40e   : > { %v1400_v16 = vpop.f32.mrf.mxu0 }
 0x40f   : > { %1419 = vst [vmem:[%s2841_s12 + $0x70] sm:$0xff] %v1400_v16 }
 0x416   : > { %v1402_v51 = vpop.f32.mrf.mxu0 }
 0x417   : > { %1420 = vst [vmem:[%s2841_s12 + $0x78] sm:$0xff] %v1402_v51 }
 0x418   : > { %2341 = shalt.err (!%p2338_p0)
}
 0x419   : > { %s2415_s14 = smov 128   ;;  %s2416_s24 = smov 8  }
 0x41a   : > { %2011 = dma.vmem_to_hbm [thread:$0]  (%p2562_p5), %s1437_s25, 2048, %s1439_s4, %s1422_s6, %s2415_s14, %s2415_s14, %s2416_s24  }
 0x41b PF: > { %s2937_s2 = sld [smem:[#allocation19_spill]]  ;;  %p2031_p3 = pnand %p1583_p11, %p2507_p6 }
 0x41d   : > { %p2032_p7 = pneg %p2031_p3 }
 0x421   : > { %s1453_s16 = sand.u32 1, %s2937_s2  }
 0x422   : > { %s1454_s19 = scalar_lea.sflag [#allocation6], %s1453_s16 }
 0x423   : > { %2383 = dma.done.wait (%p2032_p7), %s1454_s19, 2048  }
 0x424   : > { %2385 = vsyncadd (%p2032_p7), %s1454_s19, 4294965248  ;;  %s28_s10 = sadd.s32 1, %s2408_s10   ;;  %s2939_s12 = sld [smem:[#allocation23_spill]] }
 0x425   : > { %p25_p9 = scmp.ge.s32.totalorder %s28_s10, 4   ;;  %s2940_s30 = sld [smem:[#allocation20_spill]] }
 0x426   : > { %s2941_s9 = sld [smem:[#allocation22_spill]]  ;;  %s2942_s27 = smov %s2392_s28 }
 0x427   : > { %s2943_s28 = smov %s2396_s29  ;;  %27 = sbr.rel (!%p25_p9) target bundleno = 13 (0xd), region = 126 }
 0x42a   : > { %s2944_s29 = smov %s2939_s12 }
 0x42c   :  { %1460 = vsyncpa [#allocation5], 1 }
 0x42d   :  { %1462 = vsyncpa [#allocation5 + $0x1], 1 }
 0x42e   :  { %1463 = vsyncpa [#allocation8], 1 }
 0x42f   :  { %1465 = vsyncpa [#allocation8 + $0x1], 1 }
 0x430   :  { %1466 = vsyncpa [#allocation11], 1 }
 0x431   :  { %1467 = vsyncpa [#allocation6], 1 }
 0x432   :  { %1469 = vsyncpa [#allocation6 + $0x1], 1 }

</bundles_post_ra>
